<compile_context>
chip_gen: v7x
topology: tpu7x:2x2x1
jax: 0.10.0
libtpu: 0.0.40
codegen_flags: <defaults>
</compile_context>

<pallas_src>
import math

import jax
import jax.numpy as jnp
import numpy as np
from jax import lax
from jax.experimental import pallas as pl
from jax.experimental.pallas import tpu as pltpu

# ----- model hyper-parameters (small, deterministic) -----
BATCH   = 2
SEQ     = 8
D_MODEL = 32
N_HEADS = 4
D_FF    = 64
D_K     = D_MODEL // N_HEADS
LN_EPS  = 1e-5
BS      = BATCH * SEQ
NEG_BIG = -1e30


def _layernorm(x, gamma, beta):
    mu  = jnp.mean(x, axis=-1, keepdims=True)
    var = jnp.mean((x - mu) ** 2, axis=-1, keepdims=True)
    return (x - mu) * lax.rsqrt(var + LN_EPS) * gamma + beta


def encoder_layer_kernel(x_ref, bias_ref, wq_ref, wkt_ref, wvo_ref, w1_ref, w2_ref,
                         vec_ref, out_ref):
    # x_ref:    (BS, D)        flattened batch of tokens
    # bias_ref: (BS, BS)       precomputed additive attention bias (0 / -1e30)
    # wq_ref:   (D, D)         W_Q with 1/sqrt(d_k) folded into the columns
    # wkt_ref:  (D, D)         W_K^T (pre-transposed at pack time)
    # wvo_ref:  (D, H*D)       per-head W_V @ W_O fold, lane-dense (32, 128)
    # w1_ref:   (D, D_FF)      FFN weights
    # w2_ref:   (D_FF, D)
    # vec_ref:  (8, 64)        packed row vectors:
    #   row 0: bv@W_O + bo   row 1: b1   row 2: b2
    #   row 3: ln1_g  row 4: ln1_b  row 5: ln2_g  row 6: ln2_b  row 7: bq*scale
    x    = x_ref[...]                                   # (BS, D) f32
    bias = bias_ref[...]                                # (BS, BS)

    # scaled Q projection (scale already folded into W_Q / b_q)
    q = jnp.dot(x, wq_ref[...], preferred_element_type=jnp.float32) + vec_ref[7:8, :D_MODEL]

    # K^T directly in (D, BS) layout: contract W_K^T dim 1 with x dim 1 (no explicit
    # transpose op, per-head K slices become aligned sublane slices).
    # b_k is omitted: it only adds a per-query constant along the softmax axis (no effect).
    kT = lax.dot_general(wkt_ref[...], x, (((1,), (1,)), ((), ())),
                         preferred_element_type=jnp.float32)         # (D, BS)

    # fused per-head V @ W_O projection: one lane-dense (BS, H*D) = (16, 128) matmul.
    vo = jnp.dot(x, wvo_ref[...], preferred_element_type=jnp.float32)  # (BS, H*D)

    ctx = jnp.zeros((BS, D_MODEL), jnp.float32)
    for h in range(N_HEADS):                            # static unrolled loop over heads
        lo  = h * D_K
        qh  = q[:, lo:lo + D_K]                         # (BS, D_K)
        kTh = kT[lo:lo + D_K, :]                        # (D_K, BS) aligned sublane slice
        s = jnp.dot(qh, kTh, preferred_element_type=jnp.float32) + bias   # MXU-native
        m = jnp.max(s, axis=-1, keepdims=True)
        e = jnp.exp(s - m)
        p = e / jnp.sum(e, axis=-1, keepdims=True)      # exact division (f32 parity)
        ctx = ctx + jnp.dot(p, vo[:, h * D_MODEL:(h + 1) * D_MODEL],
                            preferred_element_type=jnp.float32)

    attn = ctx + vec_ref[0:1, :D_MODEL]                 # + (b_v @ W_O + b_o)

    # dropout == identity (eval mode)
    x1 = _layernorm(x + attn, vec_ref[3:4, :D_MODEL], vec_ref[4:5, :D_MODEL])

    # ----- feed-forward network -----
    h1 = jnp.dot(x1, w1_ref[...], preferred_element_type=jnp.float32) + vec_ref[1:2, :D_FF]
    h1 = jnp.maximum(h1, 0.0)
    h2 = jnp.dot(h1, w2_ref[...], preferred_element_type=jnp.float32) + vec_ref[2:3, :D_MODEL]

    x2 = _layernorm(x1 + h2, vec_ref[5:6, :D_MODEL], vec_ref[6:7, :D_MODEL])
    out_ref[...] = x2.astype(out_ref.dtype)


def pack_params(p):
    """One-time parameter packing (hoisted out of the per-call path)."""
    scale = 1.0 / math.sqrt(D_K)
    wq_s = p["wq"] * scale                              # fold 1/sqrt(d_k) into W_Q
    bq_s = p["bq"][0] * scale
    wk_t = p["wk"].T                                    # pre-transposed K projection
    # fold W_O per head into the V projection: W_VO[:, h*D:(h+1)*D] = W_V[:,h] @ W_O[h,:]
    w_vo = jnp.concatenate(
        [p["wv"][:, h * D_K:(h + 1) * D_K] @ p["wo"][h * D_K:(h + 1) * D_K, :]
         for h in range(N_HEADS)], axis=1)              # (D, H*D) = (32, 128)
    bvo = p["bv"] @ p["wo"] + p["bo"]                   # (1, D): V/O biases folded

    width = max(D_FF, D_MODEL)
    vecs = jnp.zeros((8, width), jnp.float32)
    vecs = vecs.at[0, :D_MODEL].set(bvo[0])
    vecs = vecs.at[1, :D_FF].set(p["b1"][0])
    vecs = vecs.at[2, :D_MODEL].set(p["b2"][0])
    vecs = vecs.at[3, :D_MODEL].set(p["ln1_g"][0])
    vecs = vecs.at[4, :D_MODEL].set(p["ln1_b"][0])
    vecs = vecs.at[5, :D_MODEL].set(p["ln2_g"][0])
    vecs = vecs.at[6, :D_MODEL].set(p["ln2_b"][0])
    vecs = vecs.at[7, :D_MODEL].set(bq_s)
    return (wq_s, wk_t, w_vo, p["w1"], p["w2"], vecs)


def make_attention_bias(mask, B, S):
    """(BS, BS) additive bias: block-diagonal batch isolation + key-validity mask."""
    bs = B * S
    rb = jnp.arange(bs, dtype=jnp.int32) // S
    same_batch = rb[:, None] == rb[None, :]
    key_ok = (mask.reshape(bs) != 0.0)
    valid = jnp.logical_and(same_batch, key_ok[None, :])
    return jnp.where(valid, 0.0, NEG_BIG).astype(jnp.float32)


def encoder_layer(x, mask, packed):
    B, S, D = x.shape
    bs = B * S
    wq_s, wk_t, w_vo, w1, w2, vecs = packed

    x2d = x.reshape(bs, D)                 # free (row-major contiguous)
    bias = make_attention_bias(mask, B, S)  # ~1 KiB, per-call (mask-dependent)

    operands = (x2d, bias, wq_s, wk_t, w_vo, w1, w2, vecs)
    in_specs = [pl.BlockSpec(a.shape, lambda i: (0, 0)) for a in operands]  # full 2-D blocks
    out_specs = pl.BlockSpec((bs, D), lambda i: (0, 0))

    flops = (2 * bs * D * D                      # Q
             + 2 * bs * D * D                    # K^T
             + 2 * bs * D * (N_HEADS * D)        # fused V@W_O
             + N_HEADS * (2 * bs * bs * D_K      # scores
                          + 2 * bs * bs * D)     # P @ VO_h
             + 2 * bs * D * D_FF * 2)            # FFN
    transcendentals = N_HEADS * bs * bs + 4 * bs
    bytes_accessed = sum(int(a.size) * a.dtype.itemsize for a in operands) + bs * D * 4

    out = pl.pallas_call(
        encoder_layer_kernel,
        out_shape=jax.ShapeDtypeStruct((bs, D), jnp.float32),
        grid_spec=pltpu.PrefetchScalarGridSpec(
            num_scalar_prefetch=0,
            grid=(1,),                           # whole (tiny) problem in one resident step
            in_specs=in_specs,
            out_specs=out_specs,
        ),
        compiler_params=pltpu.CompilerParams(
            dimension_semantics=("arbitrary",),
        ),
        cost_estimate=pl.CostEstimate(
            flops=flops,
            transcendentals=transcendentals,
            bytes_accessed=bytes_accessed,
        ),
    )(*operands)
    return out.reshape(B, S, D)                  # free reshape back to module layout


# ----- pure-JAX reference (for correctness check only) -----
def encoder_layer_ref(x, mask, p):
    B, S, D = x.shape
    q = x @ p["wq"] + p["bq"]
    k = x @ p["wk"] + p["bk"]
    v = x @ p["wv"] + p["bv"]
    q = q.reshape(B, S, N_HEADS, D_K).transpose(0, 2, 1, 3)
    k = k.reshape(B, S, N_HEADS, D_K).transpose(0, 2, 1, 3)
    v = v.reshape(B, S, N_HEADS, D_K).transpose(0, 2, 1, 3)
    scores = jnp.einsum("bhqd,bhkd->bhqk", q, k) / np.sqrt(D_K)
    m4 = mask[:, None, :, :]                      # [B,1,1,S]
    scores = jnp.where(m4 == 0.0, -jnp.inf, scores)
    w = jax.nn.softmax(scores, axis=-1)
    attn = jnp.einsum("bhqk,bhkd->bhqd", w, v).transpose(0, 2, 1, 3).reshape(B, S, D)
    attn = attn @ p["wo"] + p["bo"]
    x1 = _layernorm(x + attn, p["ln1_g"], p["ln1_b"])
    h = jnp.maximum(x1 @ p["w1"] + p["b1"], 0.0)
    ff = h @ p["w2"] + p["b2"]
    return _layernorm(x1 + ff, p["ln2_g"], p["ln2_b"])


def init_params(key):
    ks = jax.random.split(key, 8)
    n = lambda k, shape, s=0.05: (jax.random.normal(k, shape, jnp.float32) * s)
    return {
        "wq": n(ks[0], (D_MODEL, D_MODEL)), "bq": n(ks[1], (1, D_MODEL)),
        "wk": n(ks[2], (D_MODEL, D_MODEL)), "bk": n(ks[3], (1, D_MODEL)),
        "wv": n(ks[4], (D_MODEL, D_MODEL)), "bv": n(ks[5], (1, D_MODEL)),
        "wo": n(ks[6], (D_MODEL, D_MODEL)), "bo": n(ks[7], (1, D_MODEL)),
        "ln1_g": jnp.ones((1, D_MODEL), jnp.float32),
        "ln1_b": jnp.zeros((1, D_MODEL), jnp.float32),
        "w1": n(jax.random.fold_in(key, 100), (D_MODEL, D_FF)),
        "b1": n(jax.random.fold_in(key, 101), (1, D_FF)),
        "w2": n(jax.random.fold_in(key, 102), (D_FF, D_MODEL)),
        "b2": n(jax.random.fold_in(key, 103), (1, D_MODEL)),
        "ln2_g": jnp.ones((1, D_MODEL), jnp.float32),
        "ln2_b": jnp.zeros((1, D_MODEL), jnp.float32),
    }


if __name__ == "__main__":
    key = jax.random.PRNGKey(0)
    kx, kp = jax.random.split(key)

    x = jax.random.normal(kx, (BATCH, SEQ, D_MODEL), jnp.float32)

    # mask: [batch, 1, seq] — batch 0 fully valid, batch 1 has last 3 positions masked out
    mask_np = np.ones((BATCH, 1, SEQ), np.float32)
    mask_np[1, 0, 5:] = 0.0
    mask = jnp.asarray(mask_np)

    params = init_params(kp)
    packed = pack_params(params)                 # hoisted: packing happens once at init
    packed = tuple(jax.block_until_ready(a) for a in packed)

    out = encoder_layer(x, mask, packed)
    out = jax.block_until_ready(out)

    ref = encoder_layer_ref(x, mask, params)
    # exact softmax division + f32 throughout -> tight tolerance (only weight-fold
    # reassociation differences remain).
    np.testing.assert_allclose(np.asarray(out), np.asarray(ref), rtol=1e-4, atol=1e-4)

    print("KERNEL_OK")
</pallas_src>

<mosaic_0001>
module attributes {stable_mosaic.version = 11 : i64} {
  func.func @encoder_layer_kernel(%arg0: i32, %arg1: memref<16x32xf32, #tpu.memory_space<vmem>>, %arg2: memref<16x16xf32, #tpu.memory_space<vmem>>, %arg3: memref<32x32xf32, #tpu.memory_space<vmem>>, %arg4: memref<32x32xf32, #tpu.memory_space<vmem>>, %arg5: memref<32x128xf32, #tpu.memory_space<vmem>>, %arg6: memref<32x64xf32, #tpu.memory_space<vmem>>, %arg7: memref<64x32xf32, #tpu.memory_space<vmem>>, %arg8: memref<8x64xf32, #tpu.memory_space<vmem>>, %arg9: memref<16x32xf32, #tpu.memory_space<vmem>>) attributes {dimension_semantics = [#tpu.dimension_semantics<arbitrary>], iteration_bounds = array<i64: 1>, scalar_prefetch = 0 : i64, scratch_operands = 0 : i64, tpu.core_type = #tpu.core_type<tc>, window_params = [{pipeline_mode = #tpu.pipeline_mode<synchronous>, transform_indices = @transform_0, window_bounds = array<i64: 16, 32>}, {pipeline_mode = #tpu.pipeline_mode<synchronous>, transform_indices = @transform_1, window_bounds = array<i64: 16, 16>}, {pipeline_mode = #tpu.pipeline_mode<synchronous>, transform_indices = @transform_2, window_bounds = array<i64: 32, 32>}, {pipeline_mode = #tpu.pipeline_mode<synchronous>, transform_indices = @transform_3, window_bounds = array<i64: 32, 32>}, {pipeline_mode = #tpu.pipeline_mode<synchronous>, transform_indices = @transform_4, window_bounds = array<i64: 32, 128>}, {pipeline_mode = #tpu.pipeline_mode<synchronous>, transform_indices = @transform_5, window_bounds = array<i64: 32, 64>}, {pipeline_mode = #tpu.pipeline_mode<synchronous>, transform_indices = @transform_6, window_bounds = array<i64: 64, 32>}, {pipeline_mode = #tpu.pipeline_mode<synchronous>, transform_indices = @transform_7, window_bounds = array<i64: 8, 64>}, {pipeline_mode = #tpu.pipeline_mode<synchronous>, transform_indices = @transform_8, window_bounds = array<i64: 16, 32>}]} {
    %c0 = arith.constant 0 : index
    %c0_0 = arith.constant 0 : index
    %0 = vector.load %arg1[%c0, %c0_0] : memref<16x32xf32, #tpu.memory_space<vmem>>, vector<16x32xf32>
    %c0_1 = arith.constant 0 : index
    %c0_2 = arith.constant 0 : index
    %1 = vector.load %arg2[%c0_1, %c0_2] : memref<16x16xf32, #tpu.memory_space<vmem>>, vector<16x16xf32>
    %c0_3 = arith.constant 0 : index
    %c0_4 = arith.constant 0 : index
    %2 = vector.load %arg3[%c0_3, %c0_4] : memref<32x32xf32, #tpu.memory_space<vmem>>, vector<32x32xf32>
    %cst = arith.constant dense<0.000000e+00> : vector<16x32xf32>
    %3 = tpu.matmul %0, %2, %cst {dimension_numbers = #tpu.dot_dimension_numbers<[1], [0], [0], [1], [0, 0, 1, 1], [], []>} : vector<16x32xf32>, vector<32x32xf32>, vector<16x32xf32> -> vector<16x32xf32>
    %c7 = arith.constant 7 : index
    %c0_5 = arith.constant 0 : index
    %4 = vector.load %arg8[%c7, %c0_5] : memref<8x64xf32, #tpu.memory_space<vmem>>, vector<1x32xf32>
    %5 = vector.broadcast %4 : vector<1x32xf32> to vector<16x32xf32>
    %6 = arith.addf %3, %5 : vector<16x32xf32>
    %c0_6 = arith.constant 0 : index
    %c0_7 = arith.constant 0 : index
    %7 = vector.load %arg4[%c0_6, %c0_7] : memref<32x32xf32, #tpu.memory_space<vmem>>, vector<32x32xf32>
    %cst_8 = arith.constant dense<0.000000e+00> : vector<32x16xf32>
    %8 = tpu.matmul %7, %0, %cst_8 {dimension_numbers = #tpu.dot_dimension_numbers<[1], [1], [0], [0], [0, 0, 1, 0], [], []>} : vector<32x32xf32>, vector<16x32xf32>, vector<32x16xf32> -> vector<32x16xf32>
    %c0_9 = arith.constant 0 : index
    %c0_10 = arith.constant 0 : index
    %9 = vector.load %arg5[%c0_9, %c0_10] : memref<32x128xf32, #tpu.memory_space<vmem>>, vector<32x128xf32>
    %cst_11 = arith.constant dense<0.000000e+00> : vector<16x128xf32>
    %10 = tpu.matmul %0, %9, %cst_11 {dimension_numbers = #tpu.dot_dimension_numbers<[1], [0], [0], [1], [0, 0, 1, 1], [], []>} : vector<16x32xf32>, vector<32x128xf32>, vector<16x128xf32> -> vector<16x128xf32>
    %cst_12 = arith.constant 0.000000e+00 : f32
    %11 = vector.broadcast %cst_12 : f32 to vector<16x32xf32>
    %12 = vector.extract_strided_slice %6 {offsets = [0, 0], sizes = [16, 8], strides = [1, 1]} : vector<16x32xf32> to vector<16x8xf32>
    %13 = vector.extract_strided_slice %8 {offsets = [0, 0], sizes = [8, 16], strides = [1, 1]} : vector<32x16xf32> to vector<8x16xf32>
    %cst_13 = arith.constant dense<0.000000e+00> : vector<16x16xf32>
    %14 = tpu.matmul %12, %13, %cst_13 {dimension_numbers = #tpu.dot_dimension_numbers<[1], [0], [0], [1], [0, 0, 1, 1], [], []>} : vector<16x8xf32>, vector<8x16xf32>, vector<16x16xf32> -> vector<16x16xf32>
    %15 = arith.addf %14, %1 : vector<16x16xf32>
    %cst_14 = arith.constant dense<0xFF800000> : vector<16xf32>
    %16 = vector.multi_reduction <maximumf>, %15, %cst_14 [1] : vector<16x16xf32> to vector<16xf32>
    %17 = vector.shape_cast %16 : vector<16xf32> to vector<16x1xf32>
    %18 = vector.broadcast %17 : vector<16x1xf32> to vector<16x16xf32>
    %19 = arith.subf %15, %18 : vector<16x16xf32>
    %20 = math.exp %19 : vector<16x16xf32>
    %cst_15 = arith.constant dense<0.000000e+00> : vector<16xf32>
    %21 = vector.multi_reduction <add>, %20, %cst_15 [1] : vector<16x16xf32> to vector<16xf32>
    %22 = vector.shape_cast %21 : vector<16xf32> to vector<16x1xf32>
    %23 = vector.broadcast %22 : vector<16x1xf32> to vector<16x16xf32>
    %24 = arith.divf %20, %23 : vector<16x16xf32>
    %25 = vector.extract_strided_slice %10 {offsets = [0, 0], sizes = [16, 32], strides = [1, 1]} : vector<16x128xf32> to vector<16x32xf32>
    %cst_16 = arith.constant dense<0.000000e+00> : vector<16x32xf32>
    %26 = tpu.matmul %24, %25, %cst_16 {dimension_numbers = #tpu.dot_dimension_numbers<[1], [0], [0], [1], [0, 0, 1, 1], [], []>} : vector<16x16xf32>, vector<16x32xf32>, vector<16x32xf32> -> vector<16x32xf32>
    %27 = arith.addf %11, %26 : vector<16x32xf32>
    %28 = vector.extract_strided_slice %6 {offsets = [0, 8], sizes = [16, 8], strides = [1, 1]} : vector<16x32xf32> to vector<16x8xf32>
    %29 = vector.extract_strided_slice %8 {offsets = [8, 0], sizes = [8, 16], strides = [1, 1]} : vector<32x16xf32> to vector<8x16xf32>
    %cst_17 = arith.constant dense<0.000000e+00> : vector<16x16xf32>
    %30 = tpu.matmul %28, %29, %cst_17 {dimension_numbers = #tpu.dot_dimension_numbers<[1], [0], [0], [1], [0, 0, 1, 1], [], []>} : vector<16x8xf32>, vector<8x16xf32>, vector<16x16xf32> -> vector<16x16xf32>
    %31 = arith.addf %30, %1 : vector<16x16xf32>
    %cst_18 = arith.constant dense<0xFF800000> : vector<16xf32>
    %32 = vector.multi_reduction <maximumf>, %31, %cst_18 [1] : vector<16x16xf32> to vector<16xf32>
    %33 = vector.shape_cast %32 : vector<16xf32> to vector<16x1xf32>
    %34 = vector.broadcast %33 : vector<16x1xf32> to vector<16x16xf32>
    %35 = arith.subf %31, %34 : vector<16x16xf32>
    %36 = math.exp %35 : vector<16x16xf32>
    %cst_19 = arith.constant dense<0.000000e+00> : vector<16xf32>
    %37 = vector.multi_reduction <add>, %36, %cst_19 [1] : vector<16x16xf32> to vector<16xf32>
    %38 = vector.shape_cast %37 : vector<16xf32> to vector<16x1xf32>
    %39 = vector.broadcast %38 : vector<16x1xf32> to vector<16x16xf32>
    %40 = arith.divf %36, %39 : vector<16x16xf32>
    %41 = vector.extract_strided_slice %10 {offsets = [0, 32], sizes = [16, 32], strides = [1, 1]} : vector<16x128xf32> to vector<16x32xf32>
    %cst_20 = arith.constant dense<0.000000e+00> : vector<16x32xf32>
    %42 = tpu.matmul %40, %41, %cst_20 {dimension_numbers = #tpu.dot_dimension_numbers<[1], [0], [0], [1], [0, 0, 1, 1], [], []>} : vector<16x16xf32>, vector<16x32xf32>, vector<16x32xf32> -> vector<16x32xf32>
    %43 = arith.addf %27, %42 : vector<16x32xf32>
    %44 = vector.extract_strided_slice %6 {offsets = [0, 16], sizes = [16, 8], strides = [1, 1]} : vector<16x32xf32> to vector<16x8xf32>
    %45 = vector.extract_strided_slice %8 {offsets = [16, 0], sizes = [8, 16], strides = [1, 1]} : vector<32x16xf32> to vector<8x16xf32>
    %cst_21 = arith.constant dense<0.000000e+00> : vector<16x16xf32>
    %46 = tpu.matmul %44, %45, %cst_21 {dimension_numbers = #tpu.dot_dimension_numbers<[1], [0], [0], [1], [0, 0, 1, 1], [], []>} : vector<16x8xf32>, vector<8x16xf32>, vector<16x16xf32> -> vector<16x16xf32>
    %47 = arith.addf %46, %1 : vector<16x16xf32>
    %cst_22 = arith.constant dense<0xFF800000> : vector<16xf32>
    %48 = vector.multi_reduction <maximumf>, %47, %cst_22 [1] : vector<16x16xf32> to vector<16xf32>
    %49 = vector.shape_cast %48 : vector<16xf32> to vector<16x1xf32>
    %50 = vector.broadcast %49 : vector<16x1xf32> to vector<16x16xf32>
    %51 = arith.subf %47, %50 : vector<16x16xf32>
    %52 = math.exp %51 : vector<16x16xf32>
    %cst_23 = arith.constant dense<0.000000e+00> : vector<16xf32>
    %53 = vector.multi_reduction <add>, %52, %cst_23 [1] : vector<16x16xf32> to vector<16xf32>
    %54 = vector.shape_cast %53 : vector<16xf32> to vector<16x1xf32>
    %55 = vector.broadcast %54 : vector<16x1xf32> to vector<16x16xf32>
    %56 = arith.divf %52, %55 : vector<16x16xf32>
    %57 = vector.extract_strided_slice %10 {offsets = [0, 64], sizes = [16, 32], strides = [1, 1]} : vector<16x128xf32> to vector<16x32xf32>
    %cst_24 = arith.constant dense<0.000000e+00> : vector<16x32xf32>
    %58 = tpu.matmul %56, %57, %cst_24 {dimension_numbers = #tpu.dot_dimension_numbers<[1], [0], [0], [1], [0, 0, 1, 1], [], []>} : vector<16x16xf32>, vector<16x32xf32>, vector<16x32xf32> -> vector<16x32xf32>
    %59 = arith.addf %43, %58 : vector<16x32xf32>
    %60 = vector.extract_strided_slice %6 {offsets = [0, 24], sizes = [16, 8], strides = [1, 1]} : vector<16x32xf32> to vector<16x8xf32>
    %61 = vector.extract_strided_slice %8 {offsets = [24, 0], sizes = [8, 16], strides = [1, 1]} : vector<32x16xf32> to vector<8x16xf32>
    %cst_25 = arith.constant dense<0.000000e+00> : vector<16x16xf32>
    %62 = tpu.matmul %60, %61, %cst_25 {dimension_numbers = #tpu.dot_dimension_numbers<[1], [0], [0], [1], [0, 0, 1, 1], [], []>} : vector<16x8xf32>, vector<8x16xf32>, vector<16x16xf32> -> vector<16x16xf32>
    %63 = arith.addf %62, %1 : vector<16x16xf32>
    %cst_26 = arith.constant dense<0xFF800000> : vector<16xf32>
    %64 = vector.multi_reduction <maximumf>, %63, %cst_26 [1] : vector<16x16xf32> to vector<16xf32>
    %65 = vector.shape_cast %64 : vector<16xf32> to vector<16x1xf32>
    %66 = vector.broadcast %65 : vector<16x1xf32> to vector<16x16xf32>
    %67 = arith.subf %63, %66 : vector<16x16xf32>
    %68 = math.exp %67 : vector<16x16xf32>
    %cst_27 = arith.constant dense<0.000000e+00> : vector<16xf32>
    %69 = vector.multi_reduction <add>, %68, %cst_27 [1] : vector<16x16xf32> to vector<16xf32>
    %70 = vector.shape_cast %69 : vector<16xf32> to vector<16x1xf32>
    %71 = vector.broadcast %70 : vector<16x1xf32> to vector<16x16xf32>
    %72 = arith.divf %68, %71 : vector<16x16xf32>
    %73 = vector.extract_strided_slice %10 {offsets = [0, 96], sizes = [16, 32], strides = [1, 1]} : vector<16x128xf32> to vector<16x32xf32>
    %cst_28 = arith.constant dense<0.000000e+00> : vector<16x32xf32>
    %74 = tpu.matmul %72, %73, %cst_28 {dimension_numbers = #tpu.dot_dimension_numbers<[1], [0], [0], [1], [0, 0, 1, 1], [], []>} : vector<16x16xf32>, vector<16x32xf32>, vector<16x32xf32> -> vector<16x32xf32>
    %75 = arith.addf %59, %74 : vector<16x32xf32>
    %c0_29 = arith.constant 0 : index
    %c0_30 = arith.constant 0 : index
    %76 = vector.load %arg8[%c0_29, %c0_30] : memref<8x64xf32, #tpu.memory_space<vmem>>, vector<1x32xf32>
    %77 = vector.broadcast %76 : vector<1x32xf32> to vector<16x32xf32>
    %78 = arith.addf %75, %77 : vector<16x32xf32>
    %79 = arith.addf %0, %78 : vector<16x32xf32>
    %c3 = arith.constant 3 : index
    %c0_31 = arith.constant 0 : index
    %80 = vector.load %arg8[%c3, %c0_31] : memref<8x64xf32, #tpu.memory_space<vmem>>, vector<1x32xf32>
    %c4 = arith.constant 4 : index
    %c0_32 = arith.constant 0 : index
    %81 = vector.load %arg8[%c4, %c0_32] : memref<8x64xf32, #tpu.memory_space<vmem>>, vector<1x32xf32>
    %cst_33 = arith.constant dense<0.000000e+00> : vector<16xf32>
    %82 = vector.multi_reduction <add>, %79, %cst_33 [1] : vector<16x32xf32> to vector<16xf32>
    %83 = vector.shape_cast %82 : vector<16xf32> to vector<16x1xf32>
    %cst_34 = arith.constant 3.200000e+01 : f32
    %84 = vector.broadcast %cst_34 : f32 to vector<16x1xf32>
    %85 = arith.divf %83, %84 : vector<16x1xf32>
    %86 = vector.broadcast %85 : vector<16x1xf32> to vector<16x32xf32>
    %87 = arith.subf %79, %86 : vector<16x32xf32>
    %88 = arith.mulf %87, %87 : vector<16x32xf32>
    %cst_35 = arith.constant dense<0.000000e+00> : vector<16xf32>
    %89 = vector.multi_reduction <add>, %88, %cst_35 [1] : vector<16x32xf32> to vector<16xf32>
    %90 = vector.shape_cast %89 : vector<16xf32> to vector<16x1xf32>
    %cst_36 = arith.constant 3.200000e+01 : f32
    %91 = vector.broadcast %cst_36 : f32 to vector<16x1xf32>
    %92 = arith.divf %90, %91 : vector<16x1xf32>
    %93 = vector.broadcast %85 : vector<16x1xf32> to vector<16x32xf32>
    %94 = arith.subf %79, %93 : vector<16x32xf32>
    %cst_37 = arith.constant 9.99999974E-6 : f32
    %95 = vector.broadcast %cst_37 : f32 to vector<16x1xf32>
    %96 = arith.addf %92, %95 : vector<16x1xf32>
    %97 = math.rsqrt %96 : vector<16x1xf32>
    %98 = vector.broadcast %97 : vector<16x1xf32> to vector<16x32xf32>
    %99 = arith.mulf %94, %98 : vector<16x32xf32>
    %100 = vector.broadcast %80 : vector<1x32xf32> to vector<16x32xf32>
    %101 = arith.mulf %99, %100 : vector<16x32xf32>
    %102 = vector.broadcast %81 : vector<1x32xf32> to vector<16x32xf32>
    %103 = arith.addf %101, %102 : vector<16x32xf32>
    %c0_38 = arith.constant 0 : index
    %c0_39 = arith.constant 0 : index
    %104 = vector.load %arg6[%c0_38, %c0_39] : memref<32x64xf32, #tpu.memory_space<vmem>>, vector<32x64xf32>
    %cst_40 = arith.constant dense<0.000000e+00> : vector<16x64xf32>
    %105 = tpu.matmul %103, %104, %cst_40 {dimension_numbers = #tpu.dot_dimension_numbers<[1], [0], [0], [1], [0, 0, 1, 1], [], []>} : vector<16x32xf32>, vector<32x64xf32>, vector<16x64xf32> -> vector<16x64xf32>
    %c1 = arith.constant 1 : index
    %c0_41 = arith.constant 0 : index
    %106 = vector.load %arg8[%c1, %c0_41] : memref<8x64xf32, #tpu.memory_space<vmem>>, vector<1x64xf32>
    %107 = vector.broadcast %106 : vector<1x64xf32> to vector<16x64xf32>
    %108 = arith.addf %105, %107 : vector<16x64xf32>
    %cst_42 = arith.constant 0.000000e+00 : f32
    %109 = vector.broadcast %cst_42 : f32 to vector<16x64xf32>
    %110 = arith.maximumf %108, %109 : vector<16x64xf32>
    %c0_43 = arith.constant 0 : index
    %c0_44 = arith.constant 0 : index
    %111 = vector.load %arg7[%c0_43, %c0_44] : memref<64x32xf32, #tpu.memory_space<vmem>>, vector<64x32xf32>
    %cst_45 = arith.constant dense<0.000000e+00> : vector<16x32xf32>
    %112 = tpu.matmul %110, %111, %cst_45 {dimension_numbers = #tpu.dot_dimension_numbers<[1], [0], [0], [1], [0, 0, 1, 1], [], []>} : vector<16x64xf32>, vector<64x32xf32>, vector<16x32xf32> -> vector<16x32xf32>
    %c2 = arith.constant 2 : index
    %c0_46 = arith.constant 0 : index
    %113 = vector.load %arg8[%c2, %c0_46] : memref<8x64xf32, #tpu.memory_space<vmem>>, vector<1x32xf32>
    %114 = vector.broadcast %113 : vector<1x32xf32> to vector<16x32xf32>
    %115 = arith.addf %112, %114 : vector<16x32xf32>
    %116 = arith.addf %103, %115 : vector<16x32xf32>
    %c5 = arith.constant 5 : index
    %c0_47 = arith.constant 0 : index
    %117 = vector.load %arg8[%c5, %c0_47] : memref<8x64xf32, #tpu.memory_space<vmem>>, vector<1x32xf32>
    %c6 = arith.constant 6 : index
    %c0_48 = arith.constant 0 : index
    %118 = vector.load %arg8[%c6, %c0_48] : memref<8x64xf32, #tpu.memory_space<vmem>>, vector<1x32xf32>
    %cst_49 = arith.constant dense<0.000000e+00> : vector<16xf32>
    %119 = vector.multi_reduction <add>, %116, %cst_49 [1] : vector<16x32xf32> to vector<16xf32>
    %120 = vector.shape_cast %119 : vector<16xf32> to vector<16x1xf32>
    %cst_50 = arith.constant 3.200000e+01 : f32
    %121 = vector.broadcast %cst_50 : f32 to vector<16x1xf32>
    %122 = arith.divf %120, %121 : vector<16x1xf32>
    %123 = vector.broadcast %122 : vector<16x1xf32> to vector<16x32xf32>
    %124 = arith.subf %116, %123 : vector<16x32xf32>
    %125 = arith.mulf %124, %124 : vector<16x32xf32>
    %cst_51 = arith.constant dense<0.000000e+00> : vector<16xf32>
    %126 = vector.multi_reduction <add>, %125, %cst_51 [1] : vector<16x32xf32> to vector<16xf32>
    %127 = vector.shape_cast %126 : vector<16xf32> to vector<16x1xf32>
    %cst_52 = arith.constant 3.200000e+01 : f32
    %128 = vector.broadcast %cst_52 : f32 to vector<16x1xf32>
    %129 = arith.divf %127, %128 : vector<16x1xf32>
    %130 = vector.broadcast %122 : vector<16x1xf32> to vector<16x32xf32>
    %131 = arith.subf %116, %130 : vector<16x32xf32>
    %cst_53 = arith.constant 9.99999974E-6 : f32
    %132 = vector.broadcast %cst_53 : f32 to vector<16x1xf32>
    %133 = arith.addf %129, %132 : vector<16x1xf32>
    %134 = math.rsqrt %133 : vector<16x1xf32>
    %135 = vector.broadcast %134 : vector<16x1xf32> to vector<16x32xf32>
    %136 = arith.mulf %131, %135 : vector<16x32xf32>
    %137 = vector.broadcast %117 : vector<1x32xf32> to vector<16x32xf32>
    %138 = arith.mulf %136, %137 : vector<16x32xf32>
    %139 = vector.broadcast %118 : vector<1x32xf32> to vector<16x32xf32>
    %140 = arith.addf %138, %139 : vector<16x32xf32>
    %c0_54 = arith.constant 0 : index
    %c0_55 = arith.constant 0 : index
    %141 = vector.load %arg9[%c0_54, %c0_55] : memref<16x32xf32, #tpu.memory_space<vmem>>, vector<16x32xf32>
    tpu.vector_store %arg9[%c0_54, %c0_55], %140 {strides = array<i32>} : memref<16x32xf32, #tpu.memory_space<vmem>>, vector<16x32xf32>,
    return
  }
  func.func @transform_0(%arg0: i32) -> (i32, i32) {
    %c0_i32 = arith.constant 0 : i32
    %c0_i32_0 = arith.constant 0 : i32
    %c0_i32_1 = arith.constant 0 : i32
    return %c0_i32, %c0_i32_0 : i32, i32
  }
  func.func @transform_1(%arg0: i32) -> (i32, i32) {
    %c0_i32 = arith.constant 0 : i32
    %c0_i32_0 = arith.constant 0 : i32
    %c0_i32_1 = arith.constant 0 : i32
    return %c0_i32, %c0_i32_0 : i32, i32
  }
  func.func @transform_2(%arg0: i32) -> (i32, i32) {
    %c0_i32 = arith.constant 0 : i32
    %c0_i32_0 = arith.constant 0 : i32
    %c0_i32_1 = arith.constant 0 : i32
    return %c0_i32, %c0_i32_0 : i32, i32
  }
  func.func @transform_3(%arg0: i32) -> (i32, i32) {
    %c0_i32 = arith.constant 0 : i32
    %c0_i32_0 = arith.constant 0 : i32
    %c0_i32_1 = arith.constant 0 : i32
    return %c0_i32, %c0_i32_0 : i32, i32
  }
  func.func @transform_4(%arg0: i32) -> (i32, i32) {
    %c0_i32 = arith.constant 0 : i32
    %c0_i32_0 = arith.constant 0 : i32
    %c0_i32_1 = arith.constant 0 : i32
    return %c0_i32, %c0_i32_0 : i32, i32
  }
  func.func @transform_5(%arg0: i32) -> (i32, i32) {
    %c0_i32 = arith.constant 0 : i32
    %c0_i32_0 = arith.constant 0 : i32
    %c0_i32_1 = arith.constant 0 : i32
    return %c0_i32, %c0_i32_0 : i32, i32
  }
  func.func @transform_6(%arg0: i32) -> (i32, i32) {
    %c0_i32 = arith.constant 0 : i32
    %c0_i32_0 = arith.constant 0 : i32
    %c0_i32_1 = arith.constant 0 : i32
    return %c0_i32, %c0_i32_0 : i32, i32
  }
  func.func @transform_7(%arg0: i32) -> (i32, i32) {
    %c0_i32 = arith.constant 0 : i32
    %c0_i32_0 = arith.constant 0 : i32
    %c0_i32_1 = arith.constant 0 : i32
    return %c0_i32, %c0_i32_0 : i32, i32
  }
  func.func @transform_8(%arg0: i32) -> (i32, i32) {
    %c0_i32 = arith.constant 0 : i32
    %c0_i32_0 = arith.constant 0 : i32
    %c0_i32_1 = arith.constant 0 : i32
    return %c0_i32, %c0_i32_0 : i32, i32
  }
}

</mosaic_0001>

<bundles_post_ra>
// kernel: tpu_custom_call.1
= control target key start
LH: loop header
LB: loop body
LE: loop exit
PB: predicated region body
PF: predicated region fallthrough
CT: control target
= control target key end

     0   :  { %13 = vsyncpa [#allocation3], 0  ;;  %s2159_s0 = inlined_call_operand.hbm [shape: f32[16,32], index: 0, kind: input, shape index: {}]   ;;  %s2160_s1 = inlined_call_operand.hbm [shape: f32[16,16], index: 1, kind: input, shape index: {}]   ;;  %s2161_s2 = inlined_call_operand.vmem [shape: f32[32,32], index: 2, kind: input, shape index: {}]   ;;  %s2162_s3 = inlined_call_operand.vmem [shape: f32[32,32], index: 3, kind: input, shape index: {}]   ;;  %s2163_s4 = inlined_call_operand.vmem [shape: f32[32,128], index: 4, kind: input, shape index: {}]   ;;  %s2164_s5 = inlined_call_operand.hbm [shape: f32[32,64], index: 5, kind: input, shape index: {}]   ;;  %s2165_s6 = inlined_call_operand.vmem [shape: f32[64,32], index: 6, kind: input, shape index: {}]   ;;  %s2166_s7 = inlined_call_operand.vmem [shape: f32[8,64], index: 7, kind: input, shape index: {}]   ;;  %s2167_s8 = inlined_call_operand.hbm [shape: f32[16,32], index: 8, kind: output, shape index: {}]  }
   0x1   :  { %14 = vsyncpa [#allocation6], 0 }
   0x2   :  { %15 = vsyncpa [#allocation4], 0  ;;  %s1852_s27 = smov [#allocation5]   ;;  %s1853_s29 = smov [#allocation2]  }
   0x3   :  { %s33_s28 = sshll.u32 %s1852_s27, 4  ;;  %s21_s30 = sshll.u32 %s1853_s29, 4  ;;  %s34_s28 = int_to_ptr.vmem [resolvable:$true] %s33_s28  ;;  %s1909_s30 = int_to_ptr.vmem [resolvable:$true] %s21_s30 }
   0x4   :  { %s1758_s11 = scalar_lea.hbm %s2160_s1, 256 }
   0x5   :  { %p1759_p0 = scmp.ne.s32.totalorder %s2160_s1, %s1758_s11  ;;  %p1762_p1 = scmp.lt.u32.totalorder %s1758_s11, %s2160_s1 }
   0x7   :  { %p1764_p2 = pnand %p1762_p1, %p1759_p0 }
   0x9   :  { %1767 = shalt.err (!%p1764_p2)
}
   0xa   :  { %s1768_s16 = scalar_lea.vmem %s34_s28, 256  ;;  %p1773_p4 = scmp.lt.s32.totalorder %s34_s28, %s34_s28 }
   0xb   :  { %p1769_p3 = scmp.ne.s32.totalorder %s34_s28, %s1768_s16  ;;  %p1774_p5 = scmp.lt.s32.totalorder %s1768_s16, %s1768_s16 }
   0xd   :  { %p1775_p6 = por %p1774_p5, %p1773_p4 }
   0xf   :  { %p1776_p7 = pnand %p1775_p6, %p1769_p3 }
  0x11   :  { %1779 = shalt.err (!%p1776_p7)
}
  0x12   :  { %s1854_s17 = smov 128   ;;  %s1855_s18 = smov 8  }
  0x13   :  { %39 = dma.hbm_to_vmem [thread:$0]  %s2160_s1, 256, %s34_s28, [#allocation6], %s1854_s17, %s1854_s17, %s1855_s18  }
  0x14   :  { %s1780_s23 = scalar_lea.hbm %s2159_s0, 256 }
  0x15   :  { %p1781_p8 = scmp.ne.s32.totalorder %s2159_s0, %s1780_s23  ;;  %p1784_p9 = scmp.lt.u32.totalorder %s1780_s23, %s2159_s0 }
  0x17   :  { %p1786_p10 = pnand %p1784_p9, %p1781_p8 }
  0x19   :  { %1789 = shalt.err (!%p1786_p10)
}
  0x1a   :  { %s1790_s29 = scalar_lea.vmem %s1909_s30, 256  ;;  %p1795_p12 = scmp.lt.s32.totalorder %s1909_s30, %s1909_s30 }
  0x1b   :  { %p1791_p11 = scmp.ne.s32.totalorder %s1909_s30, %s1790_s29  ;;  %p1796_p13 = scmp.lt.s32.totalorder %s1790_s29, %s1790_s29 }
  0x1d   :  { %p1797_p0 = por %p1796_p13, %p1795_p12 }
  0x1f   :  { %p1798_p1 = pnand %p1797_p0, %p1791_p11 }
  0x21   :  { %1801 = shalt.err (!%p1798_p1)
}
  0x22   :  { %27 = dma.hbm_to_vmem [thread:$0]  %s2159_s0, 256, %s1909_s30, [#allocation3], %s1854_s17, %s1854_s17, %s1855_s18  }
  0x23   :  { %s1856_s9 = smov [#allocation7]   ;;  %s1802_s13 = scalar_lea.hbm %s2164_s5, 512 }
  0x24   :  { %s51_s10 = sshll.u32 %s1856_s9, 4  ;;  %p1803_p2 = scmp.ne.s32.totalorder %s2164_s5, %s1802_s13  ;;  %s52_s10 = int_to_ptr.vmem [resolvable:$true] %s51_s10 }
  0x25   :  { %p1806_p3 = scmp.lt.u32.totalorder %s1802_s13, %s2164_s5 }
  0x27   :  { %p1808_p4 = pnand %p1806_p3, %p1803_p2 }
  0x29   :  { %1811 = shalt.err (!%p1808_p4)
}
  0x2a   :  { %s1812_s20 = scalar_lea.vmem %s52_s10, 512  ;;  %p1817_p6 = scmp.lt.s32.totalorder %s52_s10, %s52_s10 }
  0x2b   :  { %p1813_p5 = scmp.ne.s32.totalorder %s52_s10, %s1812_s20  ;;  %p1818_p7 = scmp.lt.s32.totalorder %s1812_s20, %s1812_s20 }
  0x2d   :  { %p1819_p8 = por %p1818_p7, %p1817_p6 }
  0x2f   :  { %p1820_p9 = pnand %p1819_p8, %p1813_p5 }
  0x31   :  { %1823 = shalt.err (!%p1820_p9)
}
  0x32   :  { %57 = dma.hbm_to_vmem [thread:$0]  %s2164_s5, 512, %s52_s10, [#allocation6], %s1854_s17, %s1854_s17, %s1855_s18  }
  0x33   :  { %1846 = dma.done.wait [#allocation3], 256  }
  0x34   :  { %1847 = vsyncadd [#allocation3], 4294967040 }
  0x35   :  { %1848 = dma.done.wait [#allocation6], 768  }
  0x36   :  { %1849 = vsyncadd [#allocation6], 4294966528  ;;  %vm84_vm0 = vcmask 261120   ;;  %v75_v0 = vld [vmem:[%s2161_s2] sm:$0xff]  ;;  %v76_v1 = vld [vmem:[%s2161_s2 + $0x8] sm:$0xff]  ;;  %vm346_vm2 = vcmask 64512  }
  0x37   :  { %v77_v2 = vld [vmem:[%s2161_s2 + $0x10] sm:$0xff]  ;;  %v1623_v3 = vpack.c.bf16 %v76_v1, %v75_v0  ;;  %v78_v4 = vld [vmem:[%s2161_s2 + $0x18] sm:$0xff]  ;;  %v1973_v5 = vld [vmem:[#allocation2] sm:$0xff]  ;;  %s1857_s22 = smov 112   ;;  %s1858_s23 = smov 120   ;;  %vm428_vm3 = vcmask 130048  }
  0x38   :  { %v1627_v6 = vpack.c.bf16 %v78_v4, %v77_v2  ;;  %1521 = vmatprep.mubr.msk.f32.mxu0 %vm84_vm0, %v1973_v5  ;;  %v1977_v7 = vld [vmem:[#allocation2 + $0x8] sm:$0xff]  ;;  %vm1632_vm1 = vmpackc.low %vm84_vm0, %vm84_vm0  ;;  %v166_v9 = vld [vmem:[%s2162_s3] sm:$0xff]  ;;  %s1860_s24 = smov 96   ;;  %s1861_s25 = smov 64   ;;  %vm1269_vm4 = vcmask 523264  }
  0x39   :  { %1624 = vmatprep.subr.bf16.mxu0 %v1623_v3  ;;  %v1631_v8 = vpack.c.bf16 %v1977_v7, %v1973_v5  ;;  %v167_v10 = vld [vmem:[%s2162_s3 + $0x8] sm:$0xff]  ;;  %v168_v11 = vld [vmem:[%s2162_s3 + $0x10] sm:$0xff]  ;;  %v169_v12 = vld [vmem:[%s2162_s3 + $0x18] sm:$0xff]  ;;  %s1862_s26 = smov 32   ;;  %s1863_s29 = smov [#allocation8]  }
  0x3a   :  { %1626 = vmatpush3.bf16.msra.mxu0 %v1623_v3  ;;  %v267_v13 = vld [vmem:[%s2163_s4] sm:$0xff]  ;;  %v268_v14 = vld [vmem:[%s2163_s4 + $0x8] sm:$0xff]  ;;  %v269_v15 = vld [vmem:[%s2163_s4 + $0x10] sm:$0xff]  ;;  %s1400_s1 = sshll.u32 %s1863_s29, 4  ;;  %s1401_s1 = int_to_ptr.vmem [resolvable:$true] %s1400_s1 }
  0x3b   :  { %1628 = vmatprep.subr.bf16.mxu0 %v1627_v6  ;;  %v1637_v16 = vpack.c.bf16 %v268_v14, %v267_v13  ;;  %v270_v17 = vld [vmem:[%s2163_s4 + $0x18] sm:$0xff]  ;;  %v1413_v19 = vld [vmem:[%s2166_s7 + $0x7] ss:$0 sm:$0xff]  ;;  %s1859_s4 = smov 104   ;;  %v73_v43 = vld [vmem:[#allocation5] sm:$0xff]  ;;  %s1824_s28 = scalar_lea.vmem %s1401_s1, 256 }
  0x3c   :  { %v1641_v18 = vpack.c.bf16 %v270_v17, %v269_v15  ;;  %v74_v40 = vld [vmem:[#allocation5 + $0x8] sm:$0xff]  ;;  %p1825_p10 = scmp.ne.s32.totalorder %s1401_s1, %s1824_s28  ;;  %p1829_p11 = scmp.lt.s32.totalorder %s1401_s1, %s1401_s1 }
  0x3d   :  { %p1830_p12 = scmp.lt.s32.totalorder %s1824_s28, %s1824_s28 }
  0x3e   :  { %1630 = vmatpush3.bf16.msra.mxu0 %v1627_v6 }
  0x3f   :  { %1633 = vmatprep.subr.msk.bf16.mxu0 %vm1632_vm1, %v1631_v8  ;;  %p1831_p13 = por %p1830_p12, %p1829_p11 }
  0x41   :  { %1522 = vmatmul.mubr.msk.f32.vlgmr.msra.gmra.mrb[0].mxu0 %vm84_vm0, %v1977_v7  ;;  %p1832_p0 = pnand %p1831_p13, %p1825_p10 }
  0x42   :  { %1528 = vmatprep.mubr.msk.f32.mxu0 %vm84_vm0, %v166_v9 }
  0x47   :  { %1636 = vmatpush3.bf16.xpose.msk.msra.mxu0 %vm1632_vm1, %v1631_v8 }
  0x48   :  { %1638 = vmatprep.subr.bf16.mxu0 %v1637_v16 }
  0x4e   :  { %1529 = vmatmul.mubr.msk.f32.vlgmr.msra.gmra.mrb[2].mxu0 %vm84_vm0, %v167_v10 }
  0x4f   :  { %1531 = vmatprep.mubr.msk.f32.mxu0 %vm84_vm0, %v168_v11  ;;  %1640 = vmatpush3.bf16.msra.mxu0 %v1637_v16 }
  0x50   :  { %1642 = vmatprep.subr.bf16.mxu0 %v1641_v18 }
  0x52   :  { %1532 = vmatmul.mubr.msk.f32.gmra.mrb[4].mxu0 %vm84_vm0, %v169_v12 }
  0x53   :  { %1542 = vmatprep.mubr.msk.f32.mxu0 %vm84_vm0, %v1973_v5  ;;  %1644 = vmatpush3.bf16.msra.mxu0 %v1641_v18 }
  0x56   :  { %1543 = vmatmul.mubr.msk.f32.vlgmr.msra.gmra.mrb[6].mxu0 %vm84_vm0, %v1977_v7 }
 0x114   :  { %v1523_v20 = vpop.f32.mrb[0].mxu0 }
 0x115   :  { %v157_v21 = vpop.f32.mrb[1].mxu0  ;;  %v163_v23 = vadd.f32 %v1523_v20, %v1413_v19 }
 0x116   :  { %v158_v22 = vadd.f32 %v1413_v19, %v157_v21 }
 0x118   :  { %726 = vrot.lane.b32.xlu1 %v158_v22, %s1857_s22  ;;  %451 = vrot.lane.b32.xlu0 %v158_v22, %s1858_s23 }
 0x119   :  { %1547 = vmatprep.mubr.msk.f32.mxu1 %vm346_vm2, %v158_v22 }
 0x11c   :  { %728 = vrot.lane.b32.xlu1 %v163_v23, %s1857_s22  ;;  %453 = vrot.lane.b32.xlu0 %v163_v23, %s1858_s23 }
 0x120   :  { %922 = vrot.lane.b32.xlu1 %v163_v23, %s1859_s4  ;;  %920 = vrot.lane.b32.xlu0 %v158_v22, %s1859_s4 }
 0x121   :  { %v1530_v24 = vpop.f32.mrb[2].mxu0 }
 0x122   :  { %v248_v25 = vpop.f32.mrb[3].mxu0 }
 0x123   :  { %1545 = vmatprep.subr.mxu1 %v248_v25 }
 0x124   :  { %1546 = vmatpush3.msra.mxu1 %v248_v25 }
 0x125   :  { %1548 = vmatmul.mubr.msk.f32.vlgmr.msra.gmra.mrb[0].mxu1 %vm346_vm2, %v163_v23  ;;  %1550 = vmatprep.subr.mxu1 %v1530_v24  ;;  %v1533_v26 = vpop.f32.mrb[4].mxu0 }
 0x126   :  { %1551 = vmatpush3.msra.mxu1 %v1530_v24  ;;  %v258_v27 = vpop.f32.mrb[5].mxu0 }
 0x127   :  { %1569 = vmatprep.subr.mxu0 %v258_v27 }
 0x128   :  { %1570 = vmatpush3.msra.mxu0 %v258_v27 }
 0x129   :  { %1581 = vmatprep.subr.mxu0 %v1533_v26  ;;  %v1544_v28 = vpop.f32.mrb[6].mxu0 }
 0x12a   :  { %v337_v29 = vpop.f32.mrb[7].mxu0 }
 0x12b   :  { %v2028_v38 = vpack.i.bf16 %v1544_v28, %v337_v29  ;;  %v2030_v39 = vpack.c.bf16 %v1544_v28, %v337_v29 }
 0x18a   :  { %v727_v30 = vpop.permute.xlu1 %726  ;;  %v452_v31 = vpop.permute.xlu0 %451 }
 0x18b   :  { %1552 = vmatprep.mubr.msk.f32.mxu1 %vm346_vm2, %v452_v31  ;;  %1571 = vmatprep.mubr.msk.f32.mxu0 %vm346_vm2, %v727_v30 }
 0x18e   :  { %v729_v32 = vpop.permute.xlu1 %728  ;;  %v454_v33 = vpop.permute.xlu0 %453 }
 0x18f   :  { %1553 = vmatmul.mubr.msk.f32.vlgmr.msra.gmra.mrb[2].mxu1 %vm346_vm2, %v454_v33  ;;  %1572 = vmatmul.mubr.msk.f32.vlgmr.msra.gmra.mrb[8].mxu0 %vm346_vm2, %v729_v32 }
 0x190   :  { %1582 = vmatpush3.msra.mxu0 %v1533_v26 }
 0x192   :  { %v923_v34 = vpop.permute.xlu1 %922  ;;  %v921_v35 = vpop.permute.xlu0 %920 }
 0x193   :  { %1583 = vmatprep.mubr.msk.f32.mxu0 %vm346_vm2, %v921_v35 }
 0x194   :  { %1584 = vmatmul.mubr.msk.f32.vlgmr.msra.gmra.mrb[10].mxu0 %vm346_vm2, %v923_v34 }
 0x1f8   :  { %v1549_v36 = vpop.f32.mrb[0].mxu1 }
 0x1f9   :  { %v419_v37 = vpop.f32.mrb[1].mxu1  ;;  %v425_v56 = vadd.f32 %v1549_v36, %v74_v40 }
 0x1fa   :  { %v420_v50 = vadd.f32 %v419_v37, %v73_v43 }
 0x1fb   :  { %v432_v60 = vsel %vm428_vm3, %v425_v56, -inf }
 0x1fc   :  { %v429_v57 = vsel %vm428_vm3, %v420_v50, -inf }
 0x262   :  { %v1554_v41 = vpop.f32.mrb[2].mxu1  ;;  %v1573_v42 = vpop.f32.mrb[8].mxu0 }
 0x263   :  { %v531_v44 = vadd.f32 %v1554_v41, %v74_v40  ;;  %v525_v45 = vpop.f32.mrb[3].mxu1  ;;  %v800_v46 = vpop.f32.mrb[9].mxu0  ;;  %v806_v59 = vadd.f32 %v1573_v42, %v74_v40 }
 0x264   :  { %v526_v47 = vadd.f32 %v525_v45, %v73_v43  ;;  %v2032_v48 = vadd.f32 %v800_v46, %v73_v43 }
 0x265   :  { %v537_v49 = vsel %vm428_vm3, %v531_v44, -inf  ;;  %v812_v62 = vsel %vm428_vm3, %v806_v59, -inf }
 0x266   :  { %538 = vmax.xlane.f32.xlu1 %v537_v49  ;;  %v534_v51 = vsel %vm428_vm3, %v526_v47, -inf  ;;  %v809_v55 = vsel %vm428_vm3, %v2032_v48, -inf }
 0x267   :  { %v1585_v52 = vpop.f32.mrb[10].mxu0  ;;  %535 = vmax.xlane.f32.xlu0 %v534_v51 }
 0x268   :  { %v994_v53 = vpop.f32.mrb[11].mxu0  ;;  %v1000_v61 = vadd.f32 %v1585_v52, %v74_v40 }
 0x269   :  { %v995_v54 = vadd.f32 %v994_v53, %v73_v43 }
 0x26a   :  { %810 = vmax.xlane.f32.xlu1 %v809_v55  ;;  %v1006_v63 = vsel %vm428_vm3, %v1000_v61, -inf }
 0x26b   :  { %430 = vmax.xlane.f32.xlu0 %v429_v57  ;;  %v1003_v58 = vsel %vm428_vm3, %v995_v54, -inf }
 0x26e   :  { %1004 = vmax.xlane.f32.xlu1 %v1003_v58 }
 0x26f   :  { %433 = vmax.xlane.f32.xlu0 %v432_v60 }
 0x273   :  { %813 = vmax.xlane.f32.xlu0 %v812_v62 }
 0x277   :  { %1007 = vmax.xlane.f32.xlu0 %v1006_v63 }
 0x2f3   :  { %v539_v2 = vpop.xlane.xlu1 %538 }
 0x2f4   :  { %v536_v0 = vpop.xlane.xlu0 %535  ;;  %v541_v6 = vsub.f32 %v531_v44, %v539_v2 }
 0x2f5   :  { %v540_v1 = vsub.f32 %v526_v47, %v536_v0 }
 0x2f6   :  { %v544_v13 = vmul.f32 1.442695, %v541_v6 }
 0x2f7   :  { %v542_v8 = vmul.f32 1.442695, %v540_v1  ;;  %v811_v12 = vpop.xlane.xlu1 %810 }
 0x2f8   :  { %v431_v3 = vpop.xlane.xlu0 %430  ;;  %v815_v40 = vsub.f32 %v2032_v48, %v811_v12 }
 0x2f9   :  { %v435_v4 = vsub.f32 %v420_v50, %v431_v3 }
 0x2fa   :  { %v817_v41 = vmul.f32 1.442695, %v815_v40 }
 0x2fb   :  { %v437_v9 = vmul.f32 1.442695, %v435_v4  ;;  %v1005_v18 = vpop.xlane.xlu1 %1004 }
 0x2fc   :  { %v434_v10 = vpop.xlane.xlu0 %433  ;;  %v1009_v22 = vsub.f32 %v995_v54, %v1005_v18 }
 0x2fd   :  { %1718 = vpow2.f32 %v437_v9  ;;  %v436_v11 = vsub.f32 %v425_v56, %v434_v10 }
 0x2fe   :  { %1720 = vpow2.f32 %v542_v8  ;;  %v1011_v27 = vmul.f32 1.442695, %v1009_v22 }
 0x2ff   :  { %v439_v14 = vmul.f32 1.442695, %v436_v11 }
 0x300   :  { %v814_v15 = vpop.xlane.xlu0 %813 }
 0x301   :  { %1722 = vpow2.f32 %v439_v14  ;;  %v816_v16 = vsub.f32 %v806_v59, %v814_v15 }
 0x302   :  { %1724 = vpow2.f32 %v544_v13 }
 0x303   :  { %v819_v17 = vmul.f32 1.442695, %v816_v16  ;;  %v1440_v16 = vld [vmem:[%s2166_s7] ss:$0 sm:$0xff] }
 0x304   :  { %v1008_v19 = vpop.xlane.xlu0 %1007 }
 0x305   :  { %v1010_v20 = vsub.f32 %v1000_v61, %v1008_v19  ;;  %1726 = vpow2.f32 %v819_v17 }
 0x307   :  { %v2043_v21 = vpop.eup %1718  ;;  %v1013_v23 = vmul.f32 1.442695, %v1010_v20 }
 0x308   :  { %v441_v24 = vsel %vm428_vm3, %v2043_v21, 0.0  ;;  %v1721_v25 = vpop.eup %1720 }
 0x309   :  { %442 = vadd.xlane.f32.xlu1 %v441_v24  ;;  %1728 = vpow2.f32 %v1013_v23  ;;  %v546_v28 = vsel %vm428_vm3, %v1721_v25, 0.0 }
 0x30a   :  { %1730 = vpow2.f32 %v1011_v27 }
 0x30b   :  { %v2047_v26 = vpop.eup %1722  ;;  %1732 = vpow2.f32 %v817_v41  ;;  %v1256_v41 = vld [vmem:[%s2165_s6] sm:$0xff] }
 0x30c   :  { %v444_v29 = vsel %vm428_vm3, %v2047_v26, 0.0  ;;  %v1725_v30 = vpop.eup %1724 }
 0x30d   :  { %547 = vadd.xlane.f32.xlu1 %v546_v28  ;;  %445 = vadd.xlane.f32.xlu0 %v444_v29  ;;  %v549_v31 = vsel %vm428_vm3, %v1725_v30, 0.0 }
 0x30f   :  { %v2053_v32 = vpop.eup %1726 }
 0x310   :  { %v824_v33 = vsel %vm428_vm3, %v2053_v32, 0.0 }
 0x311   :  { %550 = vadd.xlane.f32.xlu0 %v549_v31 }
 0x313   :  { %v2057_v34 = vpop.eup %1728 }
 0x314   :  { %v1018_v35 = vsel %vm428_vm3, %v2057_v34, 0.0  ;;  %v2061_v36 = vpop.eup %1730 }
 0x315   :  { %825 = vadd.xlane.f32.xlu0 %v824_v33  ;;  %v1015_v37 = vsel %vm428_vm3, %v2061_v36, 0.0  ;;  %v1733_v42 = vpop.eup %1732 }
 0x316   :  { %v821_v43 = vsel %vm428_vm3, %v1733_v42, 0.0 }
 0x319   :  { %1019 = vadd.xlane.f32.xlu0 %v1018_v35 }
 0x31d   :  { %1016 = vadd.xlane.f32.xlu0 %v1015_v37  ;;  %v1167_v37 = vld [vmem:[#allocation7 + $0x18] sm:$0xff] }
 0x31e   :  { %1704 = vrot.lane.b32.xlu1 %v2028_v38, %s1860_s24 }
 0x333   :  { %1709 = vrot.lane.b32.xlu0 %v2028_v38, %s1861_s25 }
 0x342   :  { %822 = vadd.xlane.f32.xlu1 %v821_v43  ;;  %v1258_v43 = vld [vmem:[%s2165_s6 + $0x10] sm:$0xff] }
 0x353   :  { %1714 = vrot.lane.b32.xlu1 %v2028_v38, %s1862_s26 }
 0x396   :  { %v443_v44 = vpop.xlane.xlu1 %442 }
 0x39a   :  { %v548_v45 = vpop.xlane.xlu1 %547  ;;  %v446_v46 = vpop.xlane.xlu0 %445 }
 0x39b   :  { %1734 = vrcp.f32 %v548_v45  ;;  %v1259_v45 = vld [vmem:[%s2165_s6 + $0x18] sm:$0xff] }
 0x39c   :  { %1736 = vrcp.f32 %v443_v44 }
 0x39e   :  { %v1705_v47 = vpop.permute.xlu1 %1704  ;;  %v551_v49 = vpop.xlane.xlu0 %550 }
 0x39f   :  { %v1707_v48 = vunpack.i.h.bf16 %v1705_v47  ;;  %v1706_v50 = vunpack.i.l.bf16 %v1705_v47  ;;  %1738 = vrcp.f32 %v551_v49  ;;  %v1260_v47 = vld [vmem:[%s2165_s6 + $0x20] sm:$0xff]  ;;  %v1261_v49 = vld [vmem:[%s2165_s6 + $0x28] sm:$0xff] }
 0x3a0   :  { %1740 = vrcp.f32 %v446_v46  ;;  %v1673_v46 = vpack.c.bf16 %v1259_v45, %v1258_v43 }
 0x3a1   :  { %v1645_v51 = vpack.c.bf16 %v1707_v48, %v1706_v50  ;;  %v1677_v48 = vpack.c.bf16 %v1261_v49, %v1260_v47 }
 0x3a2   :  { %v826_v52 = vpop.xlane.xlu0 %825 }
 0x3a3   :  { %1646 = vmatprep.subr.bf16.mxu1 %v1645_v51  ;;  %1742 = vrcp.f32 %v826_v52 }
 0x3a4   :  { %1648 = vmatpush3.bf16.msra.mxu1 %v1645_v51 }
 0x3a5   :  { %v1735_v53 = vpop.eup %1734  ;;  %1650 = vmatprep.subr.bf16.mxu1 %v2030_v39 }
 0x3a6   :  { %v1020_v54 = vpop.xlane.xlu0 %1019  ;;  %v553_v38 = vmul.f32 %v1735_v53, %v1721_v25  ;;  %v1737_v55 = vpop.eup %1736 }
 0x3a7   :  { %v448_v59 = vmul.f32 %v1737_v55, %v2043_v21 }
 0x3a8   :  { %1559 = vmatprep.mubr.msk.f32.mxu1 %vm428_vm3, %v553_v38 }
 0x3a9   :  { %v1739_v56 = vpop.eup %1738 }
 0x3aa   :  { %v555_v57 = vmul.f32 %v1739_v56, %v1725_v30  ;;  %v1017_v58 = vpop.xlane.xlu0 %1016  ;;  %v1741_v61 = vpop.eup %1740  ;;  %v1441_v56 = vld [vmem:[%s2166_s7 + $0x3] ss:$0 sm:$0xff] }
 0x3ab   :  { %v450_v1 = vmul.f32 %v1741_v61, %v2047_v26  ;;  %1744 = vrcp.f32 %v1017_v58  ;;  %v1442_v58 = vld [vmem:[%s2166_s7 + $0x4] ss:$0 sm:$0xff] }
 0x3ac   :  { %1560 = vmatmul.mubr.msk.f32.vlgmr.msra.gmra.mrb[4].mxu1 %vm428_vm3, %v555_v57 }
 0x3ad   :  { %1652 = vmatpush3.bf16.msra.mxu1 %v2030_v39  ;;  %1566 = vmatprep.mubr.msk.f32.mxu1 %vm428_vm3, %v448_v59  ;;  %v1743_v8 = vpop.eup %1742 }
 0x3ae   :  { %v1710_v60 = vpop.permute.xlu0 %1709  ;;  %v830_v12 = vmul.f32 %v1743_v8, %v2053_v32 }
 0x3af   :  { %v1712_v62 = vunpack.i.h.bf16 %v1710_v60  ;;  %v1711_v63 = vunpack.i.l.bf16 %v1710_v60 }
 0x3b1   :  { %v1653_v0 = vpack.c.bf16 %v1712_v62, %v1711_v63 }
 0x3b3   :  { %1654 = vmatprep.subr.bf16.mxu1 %v1653_v0 }
 0x3b4   :  { %1567 = vmatmul.mubr.msk.f32.vlgmr.msra.gmra.mrb[4].mxu1 %vm428_vm3, %v450_v1  ;;  %v1262_v1 = vld [vmem:[%s2165_s6 + $0x30] sm:$0xff] }
 0x3b5   :  { %1656 = vmatpush3.bf16.msra.mxu1 %v1653_v0  ;;  %v1745_v9 = vpop.eup %1744 }
 0x3b6   :  { %v1022_v13 = vmul.f32 %v1745_v9, %v2061_v36  ;;  %v1166_v36 = vld [vmem:[#allocation7 + $0x10] sm:$0xff] }
 0x3b7   :  { %v1665_v40 = vpack.c.bf16 %v1167_v37, %v1166_v36  ;;  %v1449_v36 = vld [vmem:[%s2166_s7 + $0x5] ss:$0 sm:$0xff] }
 0x3cf   :  { %v823_v2 = vpop.xlane.xlu1 %822 }
 0x3d0   :  { %1746 = vrcp.f32 %v823_v2  ;;  %v1263_v2 = vld [vmem:[%s2165_s6 + $0x38] sm:$0xff] }
 0x3d1   :  { %1748 = vrcp.f32 %v1020_v54 }
 0x3d3   :  { %v1715_v3 = vpop.permute.xlu1 %1714 }
 0x3d4   :  { %v1717_v4 = vunpack.i.h.bf16 %v1715_v3  ;;  %v1716_v39 = vunpack.i.l.bf16 %v1715_v3  ;;  %v1681_v3 = vpack.c.bf16 %v1263_v2, %v1262_v1 }
 0x3d6   :  { %v1657_v6 = vpack.c.bf16 %v1717_v4, %v1716_v39  ;;  %v1443_v4 = vld [vmem:[%s2166_s7 + $0x1] ss:$0 sm:$0xff] }
 0x3d8   :  { %1658 = vmatprep.subr.bf16.mxu1 %v1657_v6 }
 0x3da   :  { %v1747_v10 = vpop.eup %1746 }
 0x3db   :  { %v828_v11 = vmul.f32 %v1747_v10, %v1733_v42  ;;  %v1749_v14 = vpop.eup %1748  ;;  %v1257_v42 = vld [vmem:[%s2165_s6 + $0x8] sm:$0xff] }
 0x3dc   :  { %v1024_v15 = vmul.f32 %v1749_v14, %v2057_v34  ;;  %v1165_v34 = vld [vmem:[#allocation7 + $0x8] sm:$0xff]  ;;  %v1669_v44 = vpack.c.bf16 %v1257_v42, %v1256_v41  ;;  %v1450_v42 = vld [vmem:[%s2166_s7 + $0x6] ss:$0 sm:$0xff] }
 0x3dd   :  { %1578 = vmatprep.mubr.msk.f32.mxu1 %vm428_vm3, %v828_v11 }
 0x3de   :  { %1579 = vmatmul.mubr.msk.f32.vlgmr.msra.gmra.mrb[4].mxu1 %vm428_vm3, %v830_v12  ;;  %v1446_v12 = vld [vmem:[%s2166_s7 + $0x2] ss:$0 sm:$0xff] }
 0x3df   :  { %1660 = vmatpush3.bf16.msra.mxu1 %v1657_v6  ;;  %1590 = vmatprep.mubr.msk.f32.mxu1 %vm428_vm3, %v1022_v13 }
 0x3e0   :  { %1670 = vmatprep.subr.bf16.mxu1 %v1669_v44 }
 0x3e6   :  { %1591 = vmatmul.mubr.msk.f32.vlgmr.msra.gmra.mrb[4].mxu1 %vm428_vm3, %v1024_v15 }
 0x3e7   :  { %1672 = vmatpush3.bf16.msra.mxu1 %v1669_v44 }
 0x3e8   :  { %1674 = vmatprep.subr.bf16.mxu1 %v1673_v46 }
 0x3eb   :  { %1676 = vmatpush3.bf16.msra.mxu1 %v1673_v46 }
 0x3ec   :  { %1678 = vmatprep.subr.bf16.mxu1 %v1677_v48 }
 0x3ef   :  { %1680 = vmatpush3.bf16.msra.mxu1 %v1677_v48 }
 0x3f0   :  { %1682 = vmatprep.subr.bf16.mxu1 %v1681_v3 }
 0x3f3   :  { %1684 = vmatpush3.bf16.msra.mxu1 %v1681_v3 }
 0x4b9   :  { %v1592_v17 = vpop.f32.mrb[4].mxu1 }
 0x4ba   :  { %v1120_v18 = vadd.f32 %v1592_v17, %v1440_v16  ;;  %v1103_v19 = vpop.f32.mrb[5].mxu1 }
 0x4bb   :  { %v1119_v20 = vadd.f32 %v1440_v16, %v1103_v19 }
 0x4bc   :  { %v1122_v21 = vadd.f32 %v1120_v18, %v1977_v7 }
 0x4bd   :  { %v1121_v22 = vadd.f32 %v1119_v20, %v1973_v5  ;;  %v1164_v5 = vld [vmem:[#allocation7] sm:$0xff] }
 0x4be   :  { %v1128_v23 = vsel %vm84_vm0, %v1122_v21, 0.0  ;;  %v1661_v35 = vpack.c.bf16 %v1165_v34, %v1164_v5 }
 0x4bf   :  { %1129 = vadd.xlane.f32.xlu0 %v1128_v23  ;;  %v1125_v24 = vsel %vm84_vm0, %v1121_v22, 0.0 }
 0x4c0   :  { %1126 = vadd.xlane.f32.xlu1 %v1125_v24  ;;  %1662 = vmatprep.subr.bf16.mxu0 %v1661_v35 }
 0x4c1   :  { %1664 = vmatpush3.bf16.msra.mxu0 %v1661_v35 }
 0x4c2   :  { %1666 = vmatprep.subr.bf16.mxu0 %v1665_v40 }
 0x4c5   :  { %1668 = vmatpush3.bf16.msra.mxu0 %v1665_v40 }
 0x54c   :  { %v1130_v25 = vpop.xlane.xlu0 %1129 }
 0x54d   :  { %v1133_v26 = vmul.f32 0.03125, %v1130_v25  ;;  %v1127_v27 = vpop.xlane.xlu1 %1126 }
 0x54e   :  { %v1132_v28 = vmul.f32 0.03125, %v1127_v27 }
 0x54f   :  { %v1135_v29 = vsub.f32 %v1122_v21, %v1133_v26 }
 0x550   :  { %v1134_v30 = vsub.f32 %v1121_v22, %v1132_v28 }
 0x551   :  { %v1137_v33 = vmul.f32 %v1135_v29, %v1135_v29 }
 0x552   :  { %v1136_v31 = vmul.f32 %v1134_v30, %v1134_v30 }
 0x553   :  { %v1141_v7 = vsel %vm84_vm0, %v1137_v33, 0.0 }
 0x554   :  { %v1138_v32 = vsel %vm84_vm0, %v1136_v31, 0.0 }
 0x555   :  { %1139 = vadd.xlane.f32.xlu1 %v1138_v32 }
 0x559   :  { %1142 = vadd.xlane.f32.xlu1 %v1141_v7 }
 0x5e2   :  { %v1140_v50 = vpop.xlane.xlu1 %1139 }
 0x5e3   :  { %v1144_v51 = vmul.f32 0.03125, %v1140_v50 }
 0x5e5   :  { %v1146_v52 = vadd.f32 1e-05, %v1144_v51 }
 0x5e6   :  { %v1143_v53 = vpop.xlane.xlu1 %1142 }
 0x5e7   :  { %1750 = vrsqrt.f32 %v1146_v52  ;;  %v1145_v54 = vmul.f32 0.03125, %v1143_v53 }
 0x5e9   :  { %v1147_v38 = vadd.f32 1e-05, %v1145_v54 }
 0x5eb   :  { %1752 = vrsqrt.f32 %v1147_v38 }
 0x5f1   :  { %v1751_v55 = vpop.eup %1750 }
 0x5f2   :  { %v1150_v57 = vmul.f32 %v1751_v55, %v1134_v30 }
 0x5f4   :  { %v1156_v59 = vmul.f32 %v1441_v56, %v1150_v57 }
 0x5f5   :  { %v1753_v60 = vpop.eup %1752 }
 0x5f6   :  { %v1151_v61 = vmul.f32 %v1753_v60, %v1135_v29  ;;  %v1162_v62 = vadd.f32 %v1442_v58, %v1156_v59 }
 0x5f8   :  { %v1157_v63 = vmul.f32 %v1441_v56, %v1151_v61  ;;  %1601 = vmatprep.mubr.msk.f32.mxu0 %vm84_vm0, %v1162_v62 }
 0x5fa   :  { %v1163_v0 = vadd.f32 %v1442_v58, %v1157_v63 }
 0x5fc   :  { %1602 = vmatmul.mubr.msk.f32.vlgmr.msra.gmra.mrb[12].mxu0 %vm84_vm0, %v1163_v0 }
 0x6cf   :  { %v1603_v39 = vpop.f32.mrb[12].mxu0 }
 0x6d0   :  { %v1251_v6 = vadd.f32 %v1603_v39, %v1443_v4  ;;  %v1245_v8 = vpop.f32.mrb[13].mxu0 }
 0x6d1   :  { %v1246_v9 = vadd.f32 %v1443_v4, %v1245_v8 }
 0x6d2   :  { %v1255_v11 = vmax.f32 %v1251_v6, 0.0 }
 0x6d3   :  { %v1254_v10 = vmax.f32 %v1246_v9, 0.0 }
 0x6d5   :  { %1620 = vmatprep.mubr.msk.f32.mxu1 %vm1269_vm4, %v1254_v10 }
 0x6d6   :  { %1621 = vmatmul.mubr.msk.f32.vlgmr.msra.gmra.mrb[6].mxu1 %vm1269_vm4, %v1255_v11 }
 0x7a9   :  { %v1622_v13 = vpop.f32.mrb[6].mxu1 }
 0x7aa   :  { %v1348_v14 = vadd.f32 %v1622_v13, %v1446_v12  ;;  %v1342_v15 = vpop.f32.mrb[7].mxu1 }
 0x7ab   :  { %v1343_v16 = vadd.f32 %v1446_v12, %v1342_v15 }
 0x7ac   :  { %v1352_v17 = vadd.f32 %v1348_v14, %v1163_v0 }
 0x7ad   :  { %v1351_v18 = vadd.f32 %v1343_v16, %v1162_v62 }
 0x7ae   :  { %v1358_v19 = vsel %vm84_vm0, %v1352_v17, 0.0 }
 0x7af   :  { %1359 = vadd.xlane.f32.xlu1 %v1358_v19  ;;  %v1355_v20 = vsel %vm84_vm0, %v1351_v18, 0.0 }
 0x7b0   :  { %1356 = vadd.xlane.f32.xlu0 %v1355_v20 }
 0x83c   :  { %v1360_v21 = vpop.xlane.xlu1 %1359 }
 0x83d   :  { %v1362_v22 = vmul.f32 0.03125, %v1360_v21  ;;  %v1357_v23 = vpop.xlane.xlu0 %1356 }
 0x83e   :  { %v1361_v24 = vmul.f32 0.03125, %v1357_v23 }
 0x83f   :  { %v1364_v25 = vsub.f32 %v1352_v17, %v1362_v22 }
 0x840   :  { %v1363_v26 = vsub.f32 %v1351_v18, %v1361_v24 }
 0x841   :  { %v1366_v27 = vmul.f32 %v1364_v25, %v1364_v25 }
 0x842   :  { %v1365_v28 = vmul.f32 %v1363_v26, %v1363_v26 }
 0x843   :  { %v1370_v29 = vsel %vm84_vm0, %v1366_v27, 0.0 }
 0x844   :  { %1371 = vadd.xlane.f32.xlu1 %v1370_v29  ;;  %v1367_v30 = vsel %vm84_vm0, %v1365_v28, 0.0 }
 0x845   :  { %1368 = vadd.xlane.f32.xlu0 %v1367_v30 }
 0x8d1   :  { %v1372_v31 = vpop.xlane.xlu1 %1371 }
 0x8d2   :  { %v1374_v32 = vmul.f32 0.03125, %v1372_v31  ;;  %v1369_v33 = vpop.xlane.xlu0 %1368 }
 0x8d3   :  { %v1373_v7 = vmul.f32 0.03125, %v1369_v33 }
 0x8d4   :  { %v1376_v5 = vadd.f32 1e-05, %v1374_v32 }
 0x8d5   :  { %v1375_v34 = vadd.f32 1e-05, %v1373_v7 }
 0x8d6   :  { %1754 = vrsqrt.f32 %v1376_v5 }
 0x8d7   :  { %1756 = vrsqrt.f32 %v1375_v34 }
 0x8e0   :  { %v1755_v35 = vpop.eup %1754 }
 0x8e1   :  { %v1757_v37 = vpop.eup %1756  ;;  %v1380_v40 = vmul.f32 %v1755_v35, %v1364_v25 }
 0x8e2   :  { %v1379_v41 = vmul.f32 %v1757_v37, %v1363_v26 }
 0x8e3   :  { %v1386_v43 = vmul.f32 %v1449_v36, %v1380_v40 }
 0x8e4   :  { %v1385_v44 = vmul.f32 %v1449_v36, %v1379_v41 }
 0x8e5   :  { %v1392_v45 = vadd.f32 %v1450_v42, %v1386_v43 }
 0x8e6   :  { %v1391_v46 = vadd.f32 %v1450_v42, %v1385_v44 }
 0x8e7   :  { %1394 = vst.msk [vmem:[#allocation8 + $0x8] sm:$0xff] %vm84_vm0, %v1392_v45 }
 0x8e8   :  { %1393 = vst.msk [vmem:[#allocation8] sm:$0xff] %vm84_vm0, %v1391_v46 }
 0x8e9   :  { %1835 = shalt.err (!%p1832_p0)
}
 0x8ea   :  { %s1836_s10 = scalar_lea.hbm %s2167_s8, 256 }
 0x8eb   :  { %p1837_p1 = scmp.ne.s32.totalorder %s2167_s8, %s1836_s10  ;;  %p1840_p2 = scmp.lt.u32.totalorder %s1836_s10, %s2167_s8 }
 0x8ed   :  { %p1842_p3 = pnand %p1840_p2, %p1837_p1 }
 0x8ef   :  { %1845 = shalt.err (!%p1842_p3)
}
 0x8f0   :  { %1406 = dma.vmem_to_hbm [thread:$0]  %s1401_s1, 256, %s2167_s8, [#allocation4], %s1854_s17, %s1854_s17, %s1855_s18  }
 0x8f1   :  { %1850 = dma.done.wait [#allocation4], 256  }
 0x8f2   :  { %1851 = vsyncadd [#allocation4], 4294967040 }
 0x8f3   :  { %1410 = vsyncpa [#allocation3], 1 }
 0x8f4   :  { %1411 = vsyncpa [#allocation6], 1 }
 0x8f5   :  { %1412 = vsyncpa [#allocation4], 1 }

</bundles_post_ra>
